<compile_context>
chip_gen: v6e
topology: v6e:2x2x1
jax: 0.10.0
libtpu: 0.0.40
codegen_flags: <defaults>
</compile_context>

<pallas_src>
import jax
import jax.numpy as jnp
from jax.experimental import pallas as pl
from jax.experimental.pallas import tpu as pltpu


# ---------------------------------------------------------------------------
# Kernel
# ---------------------------------------------------------------------------
def _adaptive_loss_kernel(losses_ref, logvars_ref, total_ref, weights_ref):
    losses = losses_ref[...]             # (1, N) f32 VMEM tile
    lv = logvars_ref[...]                # (1, N) f32 VMEM tile
    precision = jnp.exp(-lv)             # EUP transcendental
    weighted = precision * losses + lv   # VPU elementwise
    total_ref[0] = jnp.sum(weighted)     # XLU reduce -> SMEM scalar
    weights_ref[...] = precision         # (1, N) lane-resident store


def _adaptive_loss_fwd_impl(losses_vec: jax.Array, log_vars: jax.Array):
    """losses_vec: (N,), log_vars: (N,) -> (total scalar f32, precisions (N,) f32)."""
    n = losses_vec.shape[0]
    losses2d = losses_vec.astype(jnp.float32).reshape(1, n)
    logvars2d = log_vars.astype(jnp.float32).reshape(1, n)

    total, weights = pl.pallas_call(
        _adaptive_loss_kernel,
        out_shape=(
            jax.ShapeDtypeStruct((1,), jnp.float32),    # total loss  (SMEM scalar)
            jax.ShapeDtypeStruct((1, n), jnp.float32),  # precisions  (VMEM row)
        ),
        in_specs=[
            pl.BlockSpec(memory_space=pltpu.VMEM),
            pl.BlockSpec(memory_space=pltpu.VMEM),
        ],
        out_specs=(
            pl.BlockSpec(memory_space=pltpu.SMEM),
            pl.BlockSpec(memory_space=pltpu.VMEM),
        ),
        cost_estimate=pl.CostEstimate(
            flops=3 * n, transcendentals=n, bytes_accessed=12 * n
        ),
    )(losses2d, logvars2d)
    return total[0], weights[0]


# ---------------------------------------------------------------------------
# custom_vjp so log_vars behaves like a trainable nn.Parameter
# ---------------------------------------------------------------------------
@jax.custom_vjp
def adaptive_loss_weighting(losses_vec: jax.Array, log_vars: jax.Array):
    return _adaptive_loss_fwd_impl(losses_vec, log_vars)


def _alw_fwd(losses_vec, log_vars):
    total, prec = _adaptive_loss_fwd_impl(losses_vec, log_vars)
    return (total, prec), (losses_vec.astype(jnp.float32), prec)


def _alw_bwd(residuals, cotangents):
    losses_vec, prec = residuals
    g_total, g_prec = cotangents
    # total = sum(exp(-lv)*loss + lv); prec = exp(-lv)
    d_losses = g_total * prec
    d_logvars = g_total * (1.0 - prec * losses_vec) - g_prec * prec
    return d_losses, d_logvars


adaptive_loss_weighting.defvjp(_alw_fwd, _alw_bwd)


# ---------------------------------------------------------------------------
# Single-dispatch jitted entry points
# ---------------------------------------------------------------------------
@jax.jit
def weighted_loss_from_vec(losses_vec: jax.Array, log_vars: jax.Array):
    """Hot path: pre-stacked (N,) loss vector -> (total, precisions), on device."""
    return adaptive_loss_weighting(losses_vec, log_vars)


@jax.jit
def _weighted_loss_from_dict(losses: dict, log_vars: jax.Array):
    """Dict of scalar losses -> (total, {name_weight: precision}). One dispatch:
    the packing happens inside the jit, fused with the pallas_call inputs."""
    names = list(losses.keys())
    vec = jnp.stack(
        [jnp.asarray(losses[name], dtype=jnp.float32).reshape(()) for name in names]
    )
    total, prec = adaptive_loss_weighting(vec, log_vars)
    weights = {f"{name}_weight": prec[i] for i, name in enumerate(names)}
    return total, weights


class AdaptiveLossWeightingPallas:
    """JAX/Pallas port of the PyTorch AdaptiveLossWeighting module."""

    def __init__(self, num_losses: int = 3):
        # nn.Parameter(torch.zeros(num_losses)) -> deterministic zero init.
        self.num_losses = num_losses
        self.log_vars = jnp.zeros((num_losses,), dtype=jnp.float32)

    def weighted_loss(self, losses_vec: jax.Array):
        """Pre-stacked (N,) loss vector -> (total, precisions), no host sync."""
        return weighted_loss_from_vec(losses_vec, self.log_vars)

    def __call__(self, losses: dict):
        """Returns (total_loss, weights). weights values stay as device-side
        scalars (no per-step host sync); use `weights_to_floats` when logging."""
        return _weighted_loss_from_dict(losses, self.log_vars)

    @staticmethod
    def weights_to_floats(weights: dict) -> dict:
        """Single D2H transfer of all weights, only when actually logging.
        Matches the PyTorch module's `precision.item()` semantics."""
        host = jax.device_get(weights)
        return {k: float(v) for k, v in host.items()}


if __name__ == "__main__":
    key = jax.random.PRNGKey(0)
    k1, k2, k3 = jax.random.split(key, 3)
    # Three scalar losses (positive, like typical training losses).
    losses = {
        "contrastive": jnp.abs(jax.random.normal(k1, ())) + 0.1,
        "generation": jnp.abs(jax.random.normal(k2, ())) + 0.1,
        "classification": jnp.abs(jax.random.normal(k3, ())) + 0.1,
    }

    module = AdaptiveLossWeightingPallas(num_losses=3)
    total_loss, weights_dev = module(losses)
    total_loss = jax.block_until_ready(total_loss)

    # Pure-JAX reference check (dict ordering inside the jitted pytree may be
    # key-sorted, but the total is order-invariant and weights are keyed by name).
    lv = module.log_vars
    name_to_val = {name: jnp.asarray(v, jnp.float32) for name, v in losses.items()}
    ref_total = sum(
        jnp.exp(-lv[i]) * name_to_val[name] + lv[i]
        for i, name in enumerate(losses.keys())
    )
    assert jnp.allclose(total_loss, ref_total, rtol=1e-5, atol=1e-6), (
        total_loss,
        ref_total,
    )

    # Logging-time (single) host pull of the weights.
    weights = AdaptiveLossWeightingPallas.weights_to_floats(weights_dev)
    for name in losses.keys():
        # log_vars are zero-initialized, so every precision must be exp(0) = 1.
        assert abs(weights[f"{name}_weight"] - 1.0) < 1e-5, weights

    # Device-side hot path (pre-stacked vector) sanity check.
    vals = jnp.stack([name_to_val[n] for n in losses.keys()])
    tot2, prec2 = module.weighted_loss(vals)
    tot2 = jax.block_until_ready(tot2)
    ref_total_vec = jnp.sum(jnp.exp(-lv) * vals + lv)
    assert jnp.allclose(tot2, ref_total_vec, rtol=1e-5, atol=1e-6)
    assert jnp.allclose(prec2, jnp.exp(-lv), rtol=1e-5, atol=1e-6)

    # Gradient check through the custom_vjp (log_vars is trainable).
    g_lv = jax.grad(lambda p: weighted_loss_from_vec(vals, p)[0])(lv)
    g_lv = jax.block_until_ready(g_lv)
    ref_g_lv = 1.0 - jnp.exp(-lv) * vals
    assert jnp.allclose(g_lv, ref_g_lv, rtol=1e-5, atol=1e-6), (g_lv, ref_g_lv)

    print("KERNEL_OK")
</pallas_src>

<mosaic_0001>
module attributes {stable_mosaic.version = 11 : i64} {
  func.func @_adaptive_loss_kernel(%arg0: memref<1x3xf32, #tpu.memory_space<vmem>>, %arg1: memref<1x3xf32, #tpu.memory_space<vmem>>, %arg2: memref<1xf32, #tpu.memory_space<smem>>, %arg3: memref<1x3xf32, #tpu.memory_space<vmem>>) attributes {dimension_semantics = [], scalar_prefetch = 0 : i64, scratch_operands = 0 : i64, tpu.core_type = #tpu.core_type<tc>} {
    %c0 = arith.constant 0 : index
    %c0_0 = arith.constant 0 : index
    %0 = vector.load %arg0[%c0, %c0_0] : memref<1x3xf32, #tpu.memory_space<vmem>>, vector<1x3xf32>
    %c0_1 = arith.constant 0 : index
    %c0_2 = arith.constant 0 : index
    %1 = vector.load %arg1[%c0_1, %c0_2] : memref<1x3xf32, #tpu.memory_space<vmem>>, vector<1x3xf32>
    %cst = arith.constant 0.000000e+00 : f32
    %2 = vector.broadcast %cst : f32 to vector<1x3xf32>
    %3 = arith.subf %2, %1 : vector<1x3xf32>
    %4 = math.exp %3 : vector<1x3xf32>
    %5 = arith.mulf %4, %0 : vector<1x3xf32>
    %6 = arith.addf %5, %1 : vector<1x3xf32>
    %7 = vector.shape_cast %6 : vector<1x3xf32> to vector<1x1x3xf32>
    %cst_3 = arith.constant dense<0.000000e+00> : vector<1xf32>
    %8 = vector.multi_reduction <add>, %7, %cst_3 [1, 2] : vector<1x1x3xf32> to vector<1xf32>
    %9 = vector.shape_cast %8 : vector<1xf32> to vector<1x1x1xf32>
    %10 = vector.extract %9[0, 0, 0] : f32 from vector<1x1x1xf32>
    %c0_4 = arith.constant 0 : index
    %11 = memref.load %arg2[%c0_4] : memref<1xf32, #tpu.memory_space<smem>>
    memref.store %10, %arg2[%c0_4] : memref<1xf32, #tpu.memory_space<smem>>
    %c0_5 = arith.constant 0 : index
    %c0_6 = arith.constant 0 : index
    %12 = vector.load %arg3[%c0_5, %c0_6] : memref<1x3xf32, #tpu.memory_space<vmem>>, vector<1x3xf32>
    tpu.vector_store %arg3[%c0_5, %c0_6], %4 {strides = array<i32>} : memref<1x3xf32, #tpu.memory_space<vmem>>, vector<1x3xf32>,
    return
  }
}

</mosaic_0001>

<bundles_post_ra>
// kernel: _weighted_loss_from_dict.1
= control target key start
LH: loop header
LB: loop body
LE: loop exit
PB: predicated region body
PF: predicated region fallthrough
CT: control target
= control target key end

     0   :  { %s100_s0 = inlined_call_operand.vmem [shape: f32[1,3], index: 0, kind: input, shape index: {}]   ;;  %s101_s1 = inlined_call_operand.vmem [shape: f32[1,3], index: 1, kind: input, shape index: {}]   ;;  %s102_s2 = inlined_call_operand.hbm [shape: f32[1], index: 2, kind: output, shape index: {0}]   ;;  %s103_s3 = inlined_call_operand.vmem [shape: f32[1,3], index: 3, kind: output, shape index: {1}]  }
   0x1   :  { %v15_v0 = vld [vmem:[%s101_s1] sm:$0x1] }
   0x2   :  { %v16_v1 = vsub.f32 0.0, %v15_v0 }
   0x3   :  { %9 = vsyncpa [#allocation3], 0  ;;  %v14_v3 = vld [vmem:[%s100_s0] sm:$0x1]  ;;  %vm21_vm0 = vcmask 16384   ;;  %s67_s0 = smov [#allocation2]  }
   0x4   :  { %v17_v2 = vmul.f32 1.442695, %v16_v1 }
   0x6   :  { %55 = vpow2.f32 %v17_v2 }
  0x13   :  { %v56_v4 = vpop.eup %55 }
  0x14   :  { %v19_v5 = vmul.f32 %v56_v4, %v14_v3  ;;  %34 = vst.msk [vmem:[%s103_s3] sm:$0x1] %vm21_vm0, %v56_v4 }
  0x16   :  { %v20_v6 = vadd.f32 %v19_v5, %v15_v0 }
  0x18   :  { %v22_v7 = vsel %vm21_vm0, %v20_v6, 0.0 }
  0x19   :  { %23 = vadd.xlane.f32.xlu0 %v22_v7 }
  0xa2   :  { %v24_v8 = vpop.xlane.xlu0 %23 }
  0xa3   :  { %v25_v9 = vrot.slane %v24_v8, 4 }
  0xa5   :  { %v26_v10 = vadd.f32 %v25_v9, %v24_v8 }
  0xa7   :  { %v27_v11 = vrot.slane %v26_v10, 2 }
  0xa9   :  { %v28_v12 = vadd.f32 %v27_v11, %v26_v10 }
  0xab   :  { %v29_v13 = vrot.slane %v28_v12, 1 }
  0xad   :  { %v30_v14 = vadd.f32 %v29_v13, %v28_v12 }
  0xaf   :  { %52 = vpush %v30_v14 }
  0xe0   :  { %s53_s1 = spop %52 }
  0xe1   :  { %33 = sst [smem:[#allocation2]] %s53_s1 }
  0xe2   :  { %42 = dma.smem_to_hbm %s67_s0, 16, %s102_s2, [#allocation3]  }
  0xe3   :  { %65 = dma.done.wait [#allocation3], 16  }
  0xe4   :  { %66 = vsyncadd [#allocation3], 4294967280 }
  0xe5   :  { %50 = sfence }
  0xe6   :  { %51 = vsyncpa [#allocation3], 1 }

</bundles_post_ra>
